<compile_context>
chip_gen: v6e
topology: v6e:2x2x1
jax: 0.10.0
libtpu: 0.0.40
codegen_flags: <defaults>
</compile_context>

<pallas_src>
import jax
import jax.numpy as jnp
from jax.experimental import pallas as pl
from jax.experimental.pallas import tpu as pltpu


def _mbd_seq_kernel(x_seq_ref, xp0_ref, w_ref, e_ref, xp_out_ref, win_ref):
    """Fused MBD recurrence; one grid step == one MBDCell.forward step.

    x_seq_ref:  (1, B, D)    observation for the current step (streamed)
    xp0_ref:    (B, T*D)     initial past observations (flattened, lag-major)
    w_ref:      (L*D, Hp)    flattened lag weights, H padded to a lane multiple
    e_ref:      (1, B, Hp)   noise estimate for this step (lane-dense output)
    xp_out_ref: (B, T*D)     final past observations (written at last step only)
    win_ref:    (B, L*D)     persistent VMEM window scratch: [x_t | x_p]
    """
    t = pl.program_id(0)
    D = x_seq_ref.shape[-1]
    TD = xp0_ref.shape[-1]  # T * D

    # One-time init of the past-lag part of the resident window state.
    @pl.when(t == 0)
    def _init():
        win_ref[:, D:] = xp0_ref[...]

    # window = [x_t | x_p]   (lag-major feature layout, matches W.reshape(L*D, H))
    win_ref[:, :D] = x_seq_ref[0]

    # e_t = window @ W_flat : single MXU dot, lag-sum folded into the K axis,
    # f32 accumulation.
    e_ref[0] = jnp.dot(
        win_ref[...], w_ref[...], preferred_element_type=jnp.float32
    ).astype(e_ref.dtype)

    # State update for the next step: new x_p = window[:, :T*D].
    # The value is loaded BEFORE the store, so the in-scratch shift is not an
    # overlapping in-place copy.
    new_past = win_ref[:, :TD]
    win_ref[:, D:] = new_past

    @pl.when(t == pl.num_programs(0) - 1)
    def _finalize():
        xp_out_ref[...] = new_past


def make_mbd_cell(w, *, lane_multiple=128):
    """Builds (step, run_sequence) for MBDCell with weight `w` of shape (L, D, H).

    step(x_t, x_p)            : exact MBDCell.forward semantics (single step).
    run_sequence(x_seq, x_p0) : runs the cell recurrently over a whole sequence
                                inside ONE pallas_call (the performant path).
    Weight relayout / padding happens exactly once here, amortized over calls.
    """
    L, D, H = w.shape
    T = L - 1
    LD, TD = L * D, T * D
    Hp = ((H + lane_multiple - 1) // lane_multiple) * lane_multiple
    w_flat = w.reshape(LD, H)
    if Hp != H:
        w_flat = jnp.pad(w_flat, ((0, 0), (0, Hp - H)))

    def _run(x_seq, xp0_flat):
        S, B, _ = x_seq.shape
        e_pad, xp_final = pl.pallas_call(
            _mbd_seq_kernel,
            out_shape=(
                # e kept in f32 (it is the accumulation dtype and feeds state).
                jax.ShapeDtypeStruct((S, B, Hp), jnp.float32),
                jax.ShapeDtypeStruct((B, TD), x_seq.dtype),
            ),
            grid=(S,),
            in_specs=[
                pl.BlockSpec((1, B, D), lambda t: (t, 0, 0)),   # x_seq: streamed per step
                pl.BlockSpec((B, TD), lambda t: (0, 0)),        # x_p0: constant index -> DMA'd once
                pl.BlockSpec((LD, Hp), lambda t: (0, 0)),       # W:    constant index -> resident
            ],
            out_specs=(
                pl.BlockSpec((1, B, Hp), lambda t: (t, 0, 0)),  # e_t per step (lane-dense)
                pl.BlockSpec((B, TD), lambda t: (0, 0)),        # final x_p only
            ),
            scratch_shapes=[pltpu.VMEM((B, LD), x_seq.dtype)],  # persistent window state
            compiler_params=pltpu.CompilerParams(
                # Sequential recurrence carried in the VMEM scratch -> "arbitrary".
                # TODO(synk): the convolutional reformulation (shifted windows,
                # one big matmul) would make this axis "parallel" for v7x megacore.
                dimension_semantics=("arbitrary",),
            ),
        )(x_seq, xp0_flat, w_flat)
        # TODO(synk): drop this slice on the hot path if downstream consumers
        # accept the Hp-padded e (or when H is already a 128 multiple).
        return e_pad[..., :H], xp_final

    @jax.jit
    def run_sequence(x_seq, x_p0):
        """x_seq: (S, B, 1, D) or (S, B, D); x_p0: (B, T, D)
        -> (e_seq: (S, B, H), x_p_final: (B, T, D))."""
        S, B = x_seq.shape[0], x_seq.shape[1]
        x_seq2 = x_seq.reshape(S, B, D)     # metadata-only reshape
        xp0 = x_p0.reshape(B, TD)           # metadata-only reshape
        e_seq, xp_final = _run(x_seq2, xp0)
        return e_seq, xp_final.reshape(B, T, D)

    @jax.jit
    def step(x_t, x_p):
        """Single MBDCell.forward step: x_t (B, 1, D), x_p (B, T, D)
        -> (e (B, H), x_p' (B, T, D))."""
        B = x_t.shape[0]
        e_seq, xp_new = _run(x_t.reshape(1, B, D), x_p.reshape(B, TD))
        return e_seq[0], xp_new.reshape(B, T, D)

    return step, run_sequence


def mbd_cell_reference(x_t, x_p, w):
    """Pure-JAX reference (mirrors the PyTorch code exactly)."""
    x = jnp.concatenate([x_t, x_p], axis=1)               # (B, L, D)
    y = jnp.einsum("bld,ldh->blh", x, w)                  # GroupLinearLayer
    e = jnp.sum(y, axis=1)                                 # (B, H)
    return e, x[:, :-1, :]


if __name__ == "__main__":
    # Small shapes consistent with the module.
    batch = 2
    output_size = 8      # D: size of observation x_t
    hidden_size = 16     # H: number of latent causal factors
    time_lags = 3        # T; L = time_lags + 1 = 4
    num_blocks = time_lags + 1
    seq_len = 6

    key = jax.random.PRNGKey(0)
    k_w, k_xt, k_xp, k_seq = jax.random.split(key, 4)

    # Deterministic parameter init: 0.01 * randn(num_blocks, din, dout)
    w = 0.01 * jax.random.normal(
        k_w, (num_blocks, output_size, hidden_size), dtype=jnp.float32
    )
    x_t = jax.random.normal(k_xt, (batch, 1, output_size), dtype=jnp.float32)
    x_p = jax.random.normal(k_xp, (batch, time_lags, output_size), dtype=jnp.float32)
    x_seq = jax.random.normal(
        k_seq, (seq_len, batch, 1, output_size), dtype=jnp.float32
    )

    step, run_sequence = make_mbd_cell(w)

    # --- single step: exact MBDCell.forward semantics ------------------------
    e, x_p_new = step(x_t, x_p)
    jax.block_until_ready((e, x_p_new))

    e_ref, x_p_ref = mbd_cell_reference(x_t, x_p, w)
    assert e.shape == (batch, hidden_size), e.shape
    assert x_p_new.shape == (batch, time_lags, output_size), x_p_new.shape
    assert jnp.allclose(e, e_ref, atol=1e-5, rtol=1e-5)
    assert jnp.allclose(x_p_new, x_p_ref)

    # --- fused recurrence: seq_len steps in ONE pallas_call -------------------
    e_seq, xp_final = run_sequence(x_seq, x_p_new)
    jax.block_until_ready((e_seq, xp_final))

    xp_r = x_p_ref
    for t in range(seq_len):
        e_r, xp_r = mbd_cell_reference(x_seq[t], xp_r, w)
        assert jnp.allclose(e_seq[t], e_r, atol=1e-5, rtol=1e-5), t
    assert jnp.allclose(xp_final, xp_r)

    # The per-step path run recurrently agrees with the fused path as well.
    xp_k = x_p_new
    for t in range(seq_len):
        e_k, xp_k = step(x_seq[t], xp_k)
        assert jnp.allclose(e_k, e_seq[t], atol=1e-6, rtol=1e-6), t
    assert jnp.allclose(xp_k, xp_final)
    jax.block_until_ready((e_k, xp_k))

    print("KERNEL_OK")
</pallas_src>

<mosaic_0001>
module attributes {stable_mosaic.version = 11 : i64} {
  func.func @_mbd_seq_kernel(%arg0: i32, %arg1: memref<1x2x8xf32, #tpu.memory_space<vmem>>, %arg2: memref<2x24xf32, #tpu.memory_space<vmem>>, %arg3: memref<32x128xf32, #tpu.memory_space<vmem>>, %arg4: memref<1x2x128xf32, #tpu.memory_space<vmem>>, %arg5: memref<2x24xf32, #tpu.memory_space<vmem>>, %arg6: memref<2x32xf32, #tpu.memory_space<vmem>>) attributes {dimension_semantics = [#tpu.dimension_semantics<arbitrary>], iteration_bounds = array<i64: 1>, scalar_prefetch = 0 : i64, scratch_operands = 1 : i64, tpu.core_type = #tpu.core_type<tc>, window_params = [{transform_indices = @transform_0, window_bounds = array<i64: 1, 2, 8>}, {pipeline_mode = #tpu.pipeline_mode<synchronous>, transform_indices = @transform_1, window_bounds = array<i64: 2, 24>}, {pipeline_mode = #tpu.pipeline_mode<synchronous>, transform_indices = @transform_2, window_bounds = array<i64: 32, 128>}, {transform_indices = @transform_3, window_bounds = array<i64: 1, 2, 128>}, {pipeline_mode = #tpu.pipeline_mode<synchronous>, transform_indices = @transform_4, window_bounds = array<i64: 2, 24>}]} {
    %c0_i32 = arith.constant 0 : i32
    %0 = arith.cmpi eq, %arg0, %c0_i32 : i32
    %1 = arith.extui %0 : i1 to i32
    %c0_i32_0 = arith.constant 0 : i32
    %2 = arith.cmpi ne, %1, %c0_i32_0 : i32
    scf.if %2 {
      %c0_17 = arith.constant 0 : index
      %c0_18 = arith.constant 0 : index
      %17 = vector.load %arg2[%c0_17, %c0_18] : memref<2x24xf32, #tpu.memory_space<vmem>>, vector<2x24xf32>
      %c0_19 = arith.constant 0 : index
      %c8_20 = arith.constant 8 : index
      %18 = vector.load %arg6[%c0_19, %c8_20] : memref<2x32xf32, #tpu.memory_space<vmem>>, vector<2x24xf32>
      tpu.vector_store %arg6[%c0_19, %c8_20], %17 {strides = array<i32>} : memref<2x32xf32, #tpu.memory_space<vmem>>, vector<2x24xf32>,
    } else {
    }
    %c0 = arith.constant 0 : index
    %c0_1 = arith.constant 0 : index
    %c0_2 = arith.constant 0 : index
    %3 = vector.load %arg1[%c0, %c0_1, %c0_2] : memref<1x2x8xf32, #tpu.memory_space<vmem>>, vector<1x2x8xf32>
    %4 = vector.shape_cast %3 : vector<1x2x8xf32> to vector<2x8xf32>
    %c0_3 = arith.constant 0 : index
    %c0_4 = arith.constant 0 : index
    %5 = vector.load %arg6[%c0_3, %c0_4] : memref<2x32xf32, #tpu.memory_space<vmem>>, vector<2x8xf32>
    tpu.vector_store %arg6[%c0_3, %c0_4], %4 {strides = array<i32>} : memref<2x32xf32, #tpu.memory_space<vmem>>, vector<2x8xf32>,
    %c0_5 = arith.constant 0 : index
    %c0_6 = arith.constant 0 : index
    %6 = vector.load %arg6[%c0_5, %c0_6] : memref<2x32xf32, #tpu.memory_space<vmem>>, vector<2x32xf32>
    %c0_7 = arith.constant 0 : index
    %c0_8 = arith.constant 0 : index
    %7 = vector.load %arg3[%c0_7, %c0_8] : memref<32x128xf32, #tpu.memory_space<vmem>>, vector<32x128xf32>
    %cst = arith.constant dense<0.000000e+00> : vector<2x128xf32>
    %8 = tpu.matmul %6, %7, %cst {dimension_numbers = #tpu.dot_dimension_numbers<[1], [0], [0], [1], [0, 0, 1, 1], [], []>} : vector<2x32xf32>, vector<32x128xf32>, vector<2x128xf32> -> vector<2x128xf32>
    %c0_9 = arith.constant 0 : index
    %c0_10 = arith.constant 0 : index
    %c0_11 = arith.constant 0 : index
    %9 = vector.load %arg4[%c0_9, %c0_10, %c0_11] : memref<1x2x128xf32, #tpu.memory_space<vmem>>, vector<1x2x128xf32>
    %10 = vector.shape_cast %9 : vector<1x2x128xf32> to vector<2x128xf32>
    %11 = vector.shape_cast %8 : vector<2x128xf32> to vector<1x2x128xf32>
    tpu.vector_store %arg4[%c0_9, %c0_10, %c0_11], %11 {strides = array<i32>} : memref<1x2x128xf32, #tpu.memory_space<vmem>>, vector<1x2x128xf32>,
    %c0_12 = arith.constant 0 : index
    %c0_13 = arith.constant 0 : index
    %12 = vector.load %arg6[%c0_12, %c0_13] : memref<2x32xf32, #tpu.memory_space<vmem>>, vector<2x24xf32>
    %c0_14 = arith.constant 0 : index
    %c8 = arith.constant 8 : index
    %13 = vector.load %arg6[%c0_14, %c8] : memref<2x32xf32, #tpu.memory_space<vmem>>, vector<2x24xf32>
    tpu.vector_store %arg6[%c0_14, %c8], %12 {strides = array<i32>} : memref<2x32xf32, #tpu.memory_space<vmem>>, vector<2x24xf32>,
    %c0_i32_15 = arith.constant 0 : i32
    %14 = arith.cmpi eq, %arg0, %c0_i32_15 : i32
    %15 = arith.extui %14 : i1 to i32
    %c0_i32_16 = arith.constant 0 : i32
    %16 = arith.cmpi ne, %15, %c0_i32_16 : i32
    scf.if %16 {
      %c0_17 = arith.constant 0 : index
      %c0_18 = arith.constant 0 : index
      %17 = vector.load %arg5[%c0_17, %c0_18] : memref<2x24xf32, #tpu.memory_space<vmem>>, vector<2x24xf32>
      tpu.vector_store %arg5[%c0_17, %c0_18], %12 {strides = array<i32>} : memref<2x24xf32, #tpu.memory_space<vmem>>, vector<2x24xf32>,
    } else {
    }
    return
  }
  func.func @transform_0(%arg0: i32) -> (i32, i32, i32) {
    %c0_i32 = arith.constant 0 : i32
    %c0_i32_0 = arith.constant 0 : i32
    %c0_i32_1 = arith.constant 0 : i32
    return %arg0, %c0_i32, %c0_i32_0 : i32, i32, i32
  }
  func.func @transform_1(%arg0: i32) -> (i32, i32) {
    %c0_i32 = arith.constant 0 : i32
    %c0_i32_0 = arith.constant 0 : i32
    %c0_i32_1 = arith.constant 0 : i32
    return %c0_i32, %c0_i32_0 : i32, i32
  }
  func.func @transform_2(%arg0: i32) -> (i32, i32) {
    %c0_i32 = arith.constant 0 : i32
    %c0_i32_0 = arith.constant 0 : i32
    %c0_i32_1 = arith.constant 0 : i32
    return %c0_i32, %c0_i32_0 : i32, i32
  }
  func.func @transform_3(%arg0: i32) -> (i32, i32, i32) {
    %c0_i32 = arith.constant 0 : i32
    %c0_i32_0 = arith.constant 0 : i32
    %c0_i32_1 = arith.constant 0 : i32
    return %arg0, %c0_i32, %c0_i32_0 : i32, i32, i32
  }
  func.func @transform_4(%arg0: i32) -> (i32, i32) {
    %c0_i32 = arith.constant 0 : i32
    %c0_i32_0 = arith.constant 0 : i32
    %c0_i32_1 = arith.constant 0 : i32
    return %c0_i32, %c0_i32_0 : i32, i32
  }
}

</mosaic_0001>

<bundles_post_ra>
// kernel: step.1
= control target key start
LH: loop header
LB: loop body
LE: loop exit
PB: predicated region body
PF: predicated region fallthrough
CT: control target
= control target key end

     0   :  { %10 = vsyncpa [#allocation4], 0  ;;  %s189_s15 = smov [#allocation3]   ;;  %s237_s0 = inlined_call_operand.vmem [shape: f32[1,2,8], index: 0, kind: input, shape index: {}]   ;;  %s238_s1 = inlined_call_operand.vmem [shape: f32[2,24], index: 1, kind: input, shape index: {}]   ;;  %s239_s2 = inlined_call_operand.hbm [shape: f32[32,128], index: 2, kind: input, shape index: {}]   ;;  %s240_s3 = inlined_call_operand.vmem [shape: f32[1,2,128], index: 3, kind: output, shape index: {0}]   ;;  %s241_s4 = inlined_call_operand.vmem [shape: f32[2,24], index: 4, kind: output, shape index: {1}]  }
   0x1   :  { %s20_s16 = sshll.u32 %s189_s15, 4  ;;  %s21_s16 = int_to_ptr.vmem [resolvable:$true] %s20_s16 }
   0x2   :  { %s175_s17 = scalar_lea.vmem %s21_s16, 512  ;;  %p180_p1 = scmp.lt.s32.totalorder %s21_s16, %s21_s16 }
   0x3   :  { %p176_p0 = scmp.ne.s32.totalorder %s21_s16, %s175_s17  ;;  %p181_p2 = scmp.lt.s32.totalorder %s175_s17, %s175_s17 }
   0x5   :  { %p182_p3 = por %p181_p2, %p180_p1 }
   0x7   :  { %p183_p4 = pnand %p182_p3, %p176_p0 }
   0x9   :  { %186 = shalt.err (!%p183_p4)
}
   0xa   :  { %s190_s18 = smov 128   ;;  %s191_s19 = smov 8  }
   0xb   :  { %26 = dma.hbm_to_vmem [thread:$0]  %s239_s2, 512, %s21_s16, [#allocation4], %s190_s18, %s190_s18, %s191_s19  }
   0xc   :  { %187 = dma.done.wait [#allocation4], 512  }
   0xd   :  { %188 = vsyncadd [#allocation4], 4294966784  ;;  %v192_v0 = vmov 0.0   ;;  %vm193_vm0 = vmmov 0   ;;  %v34_v1 = vld [vmem:[%s238_s1] sm:$0x3] }
   0xe   :  { %151 = vmatprep.subr.mxu0 %v192_v0  ;;  %159 = vmatprep.mubr.msk.f32.mxu0 %vm193_vm0, %v192_v0  ;;  %v48_v2 = vld [vmem:[#allocation3 + $0x18] sm:$0xff]  ;;  %v47_v3 = vld [vmem:[#allocation3 + $0x10] sm:$0xff]  ;;  %v46_v4 = vld [vmem:[#allocation3 + $0x8] sm:$0xff]  ;;  %vm39_vm1 = vcmask 255040   ;;  %vm42_vm2 = vcmask 58368   ;;  %vm49_vm3 = vcmask 261120  }
   0xf   :  { %36 = vrot.lane.b32.xlu0 %v34_v1, %s191_s19  ;;  %152 = vmatpush3.msra.mxu0 %v48_v2  ;;  %v45_v5 = vld [vmem:[#allocation3] sm:$0xff]  ;;  %v41_v6 = vld [vmem:[%s237_s0] sm:$0x3]  ;;  %vm134_vm4 = vcmask 189440  }
  0x10   :  { %153 = vmatprep.subr.mxu0 %v192_v0 }
  0x11   :  { %154 = vmatpush3.msra.mxu0 %v47_v3 }
  0x12   :  { %155 = vmatprep.subr.mxu0 %v192_v0 }
  0x13   :  { %156 = vmatpush3.msra.mxu0 %v46_v4 }
  0x14   :  { %157 = vmatprep.subr.mxu0 %v192_v0 }
  0x15   :  { %158 = vmatpush3.msra.mxu0 %v45_v5 }
  0x81   :  { %v37_v7 = vpop.permute.xlu0 %36 }
  0x82   :  { %40 = vst.msk [vmem:[#allocation2] sm:$0x3] %vm39_vm1, %v37_v7 }
  0x83   :  { %43 = vst.msk [vmem:[#allocation2] sm:$0x3] %vm42_vm2, %v41_v6 }
  0x8a   :  { %v44_v8 = vld [vmem:[#allocation2] sm:$0x3] }
  0x8b   :  { %v124_v9 = vld [vmem:[#allocation2] sm:$0x3]  ;;  %160 = vmatmul.mubr.msk.f32.vlgmr.msra.gmra.mxu0 %vm49_vm3, %v44_v8 }
  0x8c   :  { %126 = vrot.lane.b32.xlu0 %v124_v9, %s191_s19  ;;  %135 = vst.msk [vmem:[%s241_s4] sm:$0x3] %vm134_vm4, %v124_v9 }
  0xfe   :  { %v127_v10 = vpop.permute.xlu0 %126 }
  0xff   :  { %130 = vst.msk [vmem:[#allocation2] sm:$0x3] %vm39_vm1, %v127_v10 }
 0x14b   :  { %v119_v11 = vpop.f32.mrf.mxu0 }
 0x14c   :  { %123 = vst [vmem:[%s240_s3] sm:$0x3] %v119_v11 }
 0x14d   :  { %v161_v12 = vpop.f32.mrf.mxu0 }
 0x14e   :  { %144 = vsyncpa [#allocation4], 1 }

</bundles_post_ra>
